<compile_context>
chip_gen: v5e
topology: v5e:2x2
jax: 0.10.0
libtpu: 0.0.40
codegen_flags: <defaults>
</compile_context>

<pallas_src>
import functools

import jax
import jax.numpy as jnp
from jax.experimental import pallas as pl
from jax.experimental.pallas import tpu as pltpu


def _policy_kernel(x_ref, w1_ref, b1_ref, w2_ref, b2_ref, out_ref, *, matmul_dtype):
    """Transposed-layout forward.

    x_ref  : [n_inputs, TB]      (batch on lanes)
    w1_ref : [n_hidden, n_inputs]
    b1_ref : [n_hidden, 1]
    w2_ref : [n_actions, n_hidden]
    b2_ref : [n_actions, 1]
    out_ref: [n_actions, TB]     (lane-dense softmax probabilities)
    """
    x = x_ref[...].astype(matmul_dtype)
    w1 = w1_ref[...].astype(matmul_dtype)
    w2 = w2_ref[...].astype(matmul_dtype)
    b1 = b1_ref[...]
    b2 = b2_ref[...]

    # Hidden layer: Linear + ReLU (MXU matmul, f32 accumulation).
    h = jnp.dot(w1, x, preferred_element_type=jnp.float32) + b1
    h = jnp.maximum(h, 0.0)

    # Output layer: Linear.
    logits = jnp.dot(w2, h.astype(matmul_dtype), preferred_element_type=jnp.float32) + b2

    # Numerically stable softmax over the action axis (rows), f32 throughout.
    # Exact division so each column sums to 1 to f32 precision (Categorical-safe).
    m = jnp.max(logits, axis=0, keepdims=True)
    e = jnp.exp(logits - m)
    denom = jnp.sum(e, axis=0, keepdims=True)
    out_ref[...] = (e / denom).astype(out_ref.dtype)


def prepare_params(w1, b1, w2, b2):
    """One-time parameter preparation (hoisted out of the per-call path).

    PyTorch-equivalent layout in: w1 [n_inputs, n_hidden], b1 [1, n_hidden],
    w2 [n_hidden, n_actions], b2 [1, n_actions].
    Out: kernel layout ([out, in] weights, [out, 1] biases), all f32.
    """
    w1t = jnp.asarray(w1, jnp.float32).T               # [n_hidden, n_inputs]
    b1c = jnp.asarray(b1, jnp.float32).reshape(-1, 1)  # [n_hidden, 1]
    w2t = jnp.asarray(w2, jnp.float32).T               # [n_actions, n_hidden]
    b2c = jnp.asarray(b2, jnp.float32).reshape(-1, 1)  # [n_actions, 1]
    return w1t, b1c, w2t, b2c


def discrete_policy_forward(x, w1t, b1c, w2t, b2c, *,
                            block_batch=1024, matmul_dtype=jnp.float32):
    """x: [B, n_inputs] -> softmax action probabilities [B, n_actions] f32.

    Small B  -> single-block call (no grid loop, minimal overhead).
    Large B  -> batch-tiled grid (block_batch lanes/step, multiple of 128),
                params VMEM-resident via constant index_maps, batch axis
                "parallel" (uses both TensorCores on v7x).
    matmul_dtype=jnp.bfloat16 halves x HBM traffic on v6e/v7x; accumulation
    and softmax stay f32.
    """
    B, n_inputs = x.shape
    n_hidden = w1t.shape[0]
    n_actions = w2t.shape[0]

    # Batch-on-lanes layout.  TODO(synk): if the caller can produce x already
    # as [n_inputs, B], this wrapper transpose disappears entirely.
    x_t = x.T
    if matmul_dtype != jnp.float32:
        x_t = x_t.astype(matmul_dtype)  # halve the dominant input DMA bytes

    kernel = functools.partial(_policy_kernel, matmul_dtype=matmul_dtype)

    use_grid = (block_batch is not None) and (B >= 2 * block_batch)

    if not use_grid:
        # Single-block path: whole problem in VMEM, lane-dense output.
        out_t = pl.pallas_call(
            kernel,
            out_shape=jax.ShapeDtypeStruct((n_actions, B), jnp.float32),
            in_specs=[pl.BlockSpec(memory_space=pltpu.MemorySpace.VMEM)] * 5,
            out_specs=pl.BlockSpec(memory_space=pltpu.MemorySpace.VMEM),
        )(x_t, w1t, b1c, w2t, b2c)
        return out_t.T

    assert block_batch % 128 == 0, "batch tile must be a multiple of 128 (lane axis)"
    pad = (-B) % block_batch
    if pad:
        x_t = jnp.pad(x_t, ((0, 0), (0, pad)))
    bp = B + pad
    n_steps = bp // block_batch

    flops = 2 * bp * (n_inputs * n_hidden + n_hidden * n_actions)
    bytes_accessed = (
        x_t.size * x_t.dtype.itemsize
        + bp * n_actions * 4
        + sum(int(a.size) * 4 for a in (w1t, b1c, w2t, b2c))
    )

    out_t = pl.pallas_call(
        kernel,
        out_shape=jax.ShapeDtypeStruct((n_actions, bp), jnp.float32),
        grid_spec=pl.GridSpec(
            grid=(n_steps,),
            in_specs=[
                pl.BlockSpec((n_inputs, block_batch), lambda i: (0, i)),
                # Constant block index -> params DMA'd once, stay VMEM-resident.
                pl.BlockSpec(w1t.shape, lambda i: (0, 0)),
                pl.BlockSpec(b1c.shape, lambda i: (0, 0)),
                pl.BlockSpec(w2t.shape, lambda i: (0, 0)),
                pl.BlockSpec(b2c.shape, lambda i: (0, 0)),
            ],
            out_specs=pl.BlockSpec((n_actions, block_batch), lambda i: (0, i)),
        ),
        compiler_params=pltpu.CompilerParams(dimension_semantics=("parallel",)),
        cost_estimate=pl.CostEstimate(
            flops=flops,
            transcendentals=bp * n_actions,
            bytes_accessed=bytes_accessed,
        ),
    )(x_t, w1t, b1c, w2t, b2c)

    if pad:
        out_t = out_t[:, :B]
    return out_t.T


def _reference_forward(x, w1, b1, w2, b2):
    h = jnp.maximum(x @ w1 + b1, 0.0)
    logits = h @ w2 + b2
    return jax.nn.softmax(logits, axis=1).astype(jnp.float32)


if __name__ == "__main__":
    # Module hyper-params (CartPole-like env): obs dim 4, 2 discrete actions.
    n_inputs = 4
    n_hidden = 16      # default n_hidden_units
    n_actions = 2      # discrete_actions.shape[0]

    key = jax.random.PRNGKey(0)
    k_x, k_w1, k_b1, k_w2, k_b2, k_xl = jax.random.split(key, 6)

    # Deterministic synthetic parameters (stand-in for init_weights), in the
    # PyTorch-equivalent [in, out] / [1, out] layout.
    w1 = jax.random.normal(k_w1, (n_inputs, n_hidden), dtype=jnp.float32) * 0.1
    b1 = jax.random.normal(k_b1, (1, n_hidden), dtype=jnp.float32) * 0.01
    w2 = jax.random.normal(k_w2, (n_hidden, n_actions), dtype=jnp.float32) * 0.1
    b2 = jax.random.normal(k_b2, (1, n_actions), dtype=jnp.float32) * 0.01

    # One-time parameter preparation (not repeated per forward call).
    params = prepare_params(w1, b1, w2, b2)

    # --- Small-batch path (single block, no grid) ---
    batch = 8
    x = jax.random.normal(k_x, (batch, n_inputs), dtype=jnp.float32)
    probs = jax.block_until_ready(discrete_policy_forward(x, *params))
    ref = _reference_forward(x, w1, b1, w2, b2)
    assert probs.shape == (batch, n_actions)
    assert probs.dtype == jnp.float32
    assert jnp.allclose(probs, ref, atol=1e-4, rtol=1e-4)
    assert jnp.allclose(jnp.sum(probs, axis=1), 1.0, atol=1e-4)

    # --- Large-batch path (batch-tiled grid, params VMEM-resident) ---
    big_batch = 4096
    xl = jax.random.normal(k_xl, (big_batch, n_inputs), dtype=jnp.float32)
    probs_l = jax.block_until_ready(
        discrete_policy_forward(xl, *params, block_batch=1024)
    )
    ref_l = _reference_forward(xl, w1, b1, w2, b2)
    assert probs_l.shape == (big_batch, n_actions)
    assert jnp.allclose(probs_l, ref_l, atol=1e-4, rtol=1e-4)
    assert jnp.allclose(jnp.sum(probs_l, axis=1), 1.0, atol=1e-4)

    # --- Large-batch path with bf16 matmul inputs (v6e/v7x throughput) ---
    probs_bf = jax.block_until_ready(
        discrete_policy_forward(xl, *params, block_batch=1024,
                                matmul_dtype=jnp.bfloat16)
    )
    assert jnp.allclose(probs_bf, ref_l, atol=2e-2)
    assert jnp.allclose(jnp.sum(probs_bf, axis=1), 1.0, atol=1e-4)

    # TODO(synk): choose_action_by_sampling (Categorical sampling + log_prob) is
    # host-side glue in the original module; it could be fused in-kernel as a
    # Gumbel-max over logits with pltpu.prng_random_bits, but is not part of
    # forward().

    print("KERNEL_OK")
</pallas_src>

<mosaic_0001>
module attributes {stable_mosaic.version = 11 : i64} {
  func.func @_policy_kernel(%arg0: memref<4x8xf32, #tpu.memory_space<vmem>>, %arg1: memref<16x4xf32, #tpu.memory_space<vmem>>, %arg2: memref<16x1xf32, #tpu.memory_space<vmem>>, %arg3: memref<2x16xf32, #tpu.memory_space<vmem>>, %arg4: memref<2x1xf32, #tpu.memory_space<vmem>>, %arg5: memref<2x8xf32, #tpu.memory_space<vmem>>) attributes {dimension_semantics = [], scalar_prefetch = 0 : i64, scratch_operands = 0 : i64, tpu.core_type = #tpu.core_type<tc>} {
    %c0 = arith.constant 0 : index
    %c0_0 = arith.constant 0 : index
    %0 = vector.load %arg0[%c0, %c0_0] : memref<4x8xf32, #tpu.memory_space<vmem>>, vector<4x8xf32>
    %c0_1 = arith.constant 0 : index
    %c0_2 = arith.constant 0 : index
    %1 = vector.load %arg1[%c0_1, %c0_2] : memref<16x4xf32, #tpu.memory_space<vmem>>, vector<16x4xf32>
    %c0_3 = arith.constant 0 : index
    %c0_4 = arith.constant 0 : index
    %2 = vector.load %arg3[%c0_3, %c0_4] : memref<2x16xf32, #tpu.memory_space<vmem>>, vector<2x16xf32>
    %c0_5 = arith.constant 0 : index
    %c0_6 = arith.constant 0 : index
    %3 = vector.load %arg2[%c0_5, %c0_6] : memref<16x1xf32, #tpu.memory_space<vmem>>, vector<16x1xf32>
    %c0_7 = arith.constant 0 : index
    %c0_8 = arith.constant 0 : index
    %4 = vector.load %arg4[%c0_7, %c0_8] : memref<2x1xf32, #tpu.memory_space<vmem>>, vector<2x1xf32>
    %cst = arith.constant dense<0.000000e+00> : vector<16x8xf32>
    %5 = tpu.matmul %1, %0, %cst {dimension_numbers = #tpu.dot_dimension_numbers<[1], [0], [0], [1], [0, 0, 1, 1], [], []>} : vector<16x4xf32>, vector<4x8xf32>, vector<16x8xf32> -> vector<16x8xf32>
    %6 = vector.broadcast %3 : vector<16x1xf32> to vector<16x8xf32>
    %7 = arith.addf %5, %6 : vector<16x8xf32>
    %cst_9 = arith.constant 0.000000e+00 : f32
    %8 = vector.broadcast %cst_9 : f32 to vector<16x8xf32>
    %9 = arith.maximumf %7, %8 : vector<16x8xf32>
    %cst_10 = arith.constant dense<0.000000e+00> : vector<2x8xf32>
    %10 = tpu.matmul %2, %9, %cst_10 {dimension_numbers = #tpu.dot_dimension_numbers<[1], [0], [0], [1], [0, 0, 1, 1], [], []>} : vector<2x16xf32>, vector<16x8xf32>, vector<2x8xf32> -> vector<2x8xf32>
    %11 = vector.broadcast %4 : vector<2x1xf32> to vector<2x8xf32>
    %12 = arith.addf %10, %11 : vector<2x8xf32>
    %cst_11 = arith.constant dense<0xFF800000> : vector<8xf32>
    %13 = vector.multi_reduction <maximumf>, %12, %cst_11 [0] : vector<2x8xf32> to vector<8xf32>
    %14 = vector.shape_cast %13 : vector<8xf32> to vector<1x8xf32>
    %15 = vector.broadcast %14 : vector<1x8xf32> to vector<2x8xf32>
    %16 = arith.subf %12, %15 : vector<2x8xf32>
    %17 = math.exp %16 : vector<2x8xf32>
    %cst_12 = arith.constant dense<0.000000e+00> : vector<8xf32>
    %18 = vector.multi_reduction <add>, %17, %cst_12 [0] : vector<2x8xf32> to vector<8xf32>
    %19 = vector.shape_cast %18 : vector<8xf32> to vector<1x8xf32>
    %20 = vector.broadcast %19 : vector<1x8xf32> to vector<2x8xf32>
    %21 = arith.divf %17, %20 : vector<2x8xf32>
    %c0_13 = arith.constant 0 : index
    %c0_14 = arith.constant 0 : index
    %22 = vector.load %arg5[%c0_13, %c0_14] : memref<2x8xf32, #tpu.memory_space<vmem>>, vector<2x8xf32>
    tpu.vector_store %arg5[%c0_13, %c0_14], %21 {strides = array<i32>} : memref<2x8xf32, #tpu.memory_space<vmem>>, vector<2x8xf32>,
    return
  }
}

</mosaic_0001>

<bundles_post_ra>
// kernel: tpu_custom_call.1
= control target key start
LH: loop header
LB: loop body
LE: loop exit
PB: predicated region body
PF: predicated region fallthrough
CT: control target
= control target key end

     0   :  { %vm45_vm0 = vcmask 1043456   ;;  %vm38_vm1 = vcmask 31744   ;;  %s251_s0 = inlined_call_operand.vmem [shape: f32[4,8], index: 0, kind: input, shape index: {}]   ;;  %s252_s1 = inlined_call_operand.vmem [shape: f32[16,4], index: 1, kind: input, shape index: {}]   ;;  %s253_s2 = inlined_call_operand.vmem [shape: f32[16,1], index: 2, kind: input, shape index: {}]   ;;  %s254_s3 = inlined_call_operand.vmem [shape: f32[2,16], index: 3, kind: input, shape index: {}]   ;;  %s255_s4 = inlined_call_operand.vmem [shape: f32[2,1], index: 4, kind: input, shape index: {}]   ;;  %s256_s5 = inlined_call_operand.hbm [shape: f32[2,8], index: 5, kind: output, shape index: {}]  }
   0x1   :  { %v21_v0 = vld [vmem:[%s251_s0] sm:$0xf]  ;;  %v23_v2 = vld [vmem:[%s252_s1 + $0x8] sm:$0xff] }
   0x2   :  { %v22_v1 = vld [vmem:[%s252_s1] sm:$0xff]  ;;  %153 = vmatpush.msk.msra.mxu0 %vm45_vm0, %v21_v0  ;;  %157 = vmatpush.msk.msra.mxu2 %vm45_vm0, %v21_v0  ;;  %v26_v3 = vld [vmem:[%s253_s2 + $0x8] sm:$0xff] }
   0x3   :  { %10 = vsyncpa [#allocation3], 0  ;;  %154 = vmatmul.msk.f32.vlgmr.msra.gmra.mxu0 %vm38_vm1, %v22_v1  ;;  %155 = vmatmul.msk.f32.vlgmr.msra.gmra.mxu2 %vm38_vm1, %v23_v2  ;;  %v192_v4 = vmov 0   ;;  %v25_v5 = vld [vmem:[%s253_s2] sm:$0xff]  ;;  %vm79_vm2 = vcmask 130048   ;;  %vm103_vm3 = vcmask 58368  }
   0x4   :  { %160 = vset.pattern.permute.xlu0 %v192_v4  ;;  %161 = vset.pattern.permute.xlu1 %v192_v4  ;;  %v27_v6 = vld [vmem:[%s255_s4] sm:$0x3]  ;;  %s193_s2 = smov [#allocation2]   ;;  %s144_s6 = sshll.u32 %s256_s5, 4  ;;  %s145_s6 = int_to_ptr.hbm [resolvable:$true] %s144_s6 }
   0x5   :  { %35 = vperm.xlu0 %160, %v26_v3   ;;  %76 = vperm.xlu1 %161, %v27_v6   ;;  %v24_v15 = vld [vmem:[%s254_s3] sm:$0x3]  ;;  %s142_s3 = sshll.u32 %s193_s2, 4  ;;  %s143_s3 = int_to_ptr.vmem [resolvable:$true] %s142_s3 }
   0xd   :  { %30 = vperm.xlu0 %160, %v25_v5  }
  0x77   :  { %v36_v7 = vpop.permute.xlu0 %35  ;;  %v77_v16 = vpop.permute.xlu1 %76 }
  0x7f   :  { %v31_v8 = vpop.permute.xlu0 %30 }
  0x80   :  { %v66_v9 = vpop.f32.mrf.mxu0 }
  0x81   :  { %v67_v11 = vadd.f32 %v66_v9, %v31_v8 }
  0x83   :  { %v72_v14 = vmax.f32 %v67_v11, 0.0 }
  0x86   :  { %v69_v10 = vpop.f32.mrf.mxu2 }
  0x87   :  { %v70_v12 = vadd.f32 %v69_v10, %v36_v7 }
  0x89   :  { %v73_v13 = vmax.f32 %v70_v12, 0.0 }
  0x8b   :  { %97 = vmatpush.msra.mxu1 %v73_v13 }
  0x8d   :  { %98 = vmatpush.msra.mxu1 %v72_v14 }
  0x8e   :  { %156 = vmatmul.msk.f32.vlgmr.msra.gmra.mxu1 %vm79_vm2, %v24_v15 }
 0x10b   :  { %v100_v17 = vpop.f32.mrf.mxu1 }
 0x10c   :  { %v101_v18 = vadd.f32 %v100_v17, %v77_v16 }
 0x10e   :  { %v104_v19 = vsel %vm103_vm3, %v101_v18, -inf }
 0x10f   :  { %v105_v20 = vrot.slane %v104_v19, 4 }
 0x111   :  { %v106_v21 = vmax.f32 %v104_v19, %v105_v20 }
 0x113   :  { %v107_v22 = vrot.slane %v106_v21, 2 }
 0x115   :  { %v108_v23 = vmax.f32 %v106_v21, %v107_v22 }
 0x117   :  { %v109_v24 = vrot.slane %v108_v23, 1 }
 0x119   :  { %v110_v25 = vmax.f32 %v108_v23, %v109_v24 }
 0x11b   :  { %v111_v26 = vsub.f32 %v101_v18, %v110_v25 }
 0x11d   :  { %v112_v27 = vmul.f32 1.442695, %v111_v26 }
 0x11f   :  { %162 = vpow2.f32 %v112_v27 }
 0x125   :  { %v163_v28 = vpop.eup %162 }
 0x126   :  { %v114_v29 = vsel %vm103_vm3, %v163_v28, 0.0 }
 0x127   :  { %v115_v30 = vrot.slane %v114_v29, 4 }
 0x129   :  { %v116_v31 = vadd.f32 %v115_v30, %v114_v29 }
 0x12b   :  { %v117_v32 = vrot.slane %v116_v31, 2 }
 0x12d   :  { %v118_v33 = vadd.f32 %v117_v32, %v116_v31 }
 0x12f   :  { %v119_v34 = vrot.slane %v118_v33, 1 }
 0x131   :  { %v120_v35 = vadd.f32 %v119_v34, %v118_v33 }
 0x133   :  { %164 = vrcp.f32 %v120_v35  ;;  %v132_v39 = vand.u32 2147483648, %v120_v35  ;;  %v130_v41 = vand.u32 2147483647, %v120_v35  ;;  %vm126_vm5 = vweird.f32 %v120_v35 }
 0x135   :  { %v133_v43 = vor.u32 1.1754944e-38, %v132_v39  ;;  %vm131_vm7 = vcmp.eq.f32.partialorder %v130_v41, 8.507059e+37 }
 0x139   :  { %v165_v36 = vpop.eup %164 }
 0x13a   :  { %v122_v37 = vmul.f32 %v165_v36, %v120_v35  ;;  %vm127_vm4 = vweird.f32 %v165_v36 }
 0x13b   :  { %vm128_vm6 = vmor %vm126_vm5, %vm127_vm4 }
 0x13c   :  { %v123_v38 = vsub.f32 1.0, %v122_v37 }
 0x13e   :  { %v124_v40 = vmul.f32 %v165_v36, %v123_v38 }
 0x140   :  { %v125_v42 = vadd.f32 %v165_v36, %v124_v40 }
 0x142   :  { %v129_v44 = vsel %vm128_vm6, %v165_v36, %v125_v42 }
 0x143   :  { %v134_v45 = vsel %vm131_vm7, %v133_v43, %v129_v44 }
 0x144   :  { %v135_v46 = vmul.f32 %v163_v28, %v134_v45 }
 0x146   :  { %136 = vst.msk [vmem:[#allocation2] sm:$0x3] %vm103_vm3, %v135_v46 }
 0x147   :  { %147 = dma.vmem_to_hbm [thread:$0]  %s143_s3, 32, %s145_s6, [#allocation3]  }
 0x148   :  { %190 = dma.done.wait [#allocation3], 32  }
 0x149   :  { %191 = vsyncadd [#allocation3], 4294967264 }
 0x14a   :  { %152 = vsyncpa [#allocation3], 1 }

</bundles_post_ra>
